<compile_context>
chip_gen: v7x
topology: tpu7x:2x2x1
jax: 0.10.0
libtpu: 0.0.40
codegen_flags: <defaults>
</compile_context>

<pallas_src>
import functools

import jax
import jax.numpy as jnp
from jax.experimental import pallas as pl
from jax.experimental.pallas import tpu as pltpu


def _round_up(x, m):
    return (x + m - 1) // m * m


# ---------------------------------------------------------------------------
# Kernel
# ---------------------------------------------------------------------------
def actor_kernel(x_ref, p_ref, out_ref, *, n_obs, d1, d2, dh,
                 off_w2, off_wh, off_b):
    """Fused 3-matmul MLP head.  All slab offsets are static Python ints."""
    n_act = dh // 2

    x = x_ref[...]                                      # (B, n_obs)

    # Static, aligned slices of the single parameter slab.
    w1 = p_ref[0:n_obs, 0:d1]                           # (n_obs, d1)
    w2 = p_ref[off_w2:off_w2 + d1, 0:d2]                # (d1, d2)
    wh = p_ref[off_wh:off_wh + d2, 0:dh]                # (d2, dh) = [wmu | wls]
    b1 = p_ref[off_b + 0:off_b + 1, 0:d1]               # (1, d1)
    b2 = p_ref[off_b + 8:off_b + 9, 0:d2]               # (1, d2)
    bh = p_ref[off_b + 16:off_b + 17, 0:dh]             # (1, dh)

    # lin1 + SiLU
    h1 = jnp.dot(x, w1, preferred_element_type=jnp.float32) + b1
    h1 = h1 * jax.nn.sigmoid(h1)

    # lin2 + SiLU
    h2 = jnp.dot(h1, w2, preferred_element_type=jnp.float32) + b2
    h2 = h2 * jax.nn.sigmoid(h2)

    # Fused heads: one matmul -> [mu_logits | lsig]
    head = jnp.dot(h2, wh, preferred_element_type=jnp.float32) + bh

    # Whole-vreg nonlinearities + lane-mask select, single unmasked-as-possible
    # full-ref store (no lane-offset partial stores).
    mu_full = jax.nn.sigmoid(head)
    # sigma = clamp(-relu(lsig), min=-10); exp(sigma) == exp(-clip(lsig, 0, 10))
    sig_full = jnp.exp(-jnp.clip(head, 0.0, 10.0))
    lane = jax.lax.broadcasted_iota(jnp.int32, head.shape, dimension=1)
    out_ref[...] = jnp.where(lane < n_act, mu_full, sig_full)


# ---------------------------------------------------------------------------
# Wrapper
# ---------------------------------------------------------------------------
def actor_forward(x, slab, meta):
    """x: (B, n_obs) f32.  slab/meta from pack_params().

    Returns the packed (B, 2*n_act) output: lanes [:n_act] = mu,
    lanes [n_act:] = sigma.  (Packed return avoids trailing-lane slices in the
    wrapper; split at the caller only if needed.)
    """
    B = x.shape[0]
    dh = meta["dh"]

    kernel = functools.partial(
        actor_kernel,
        n_obs=meta["n_obs"], d1=meta["d1"], d2=meta["d2"], dh=dh,
        off_w2=meta["off_w2"], off_wh=meta["off_wh"], off_b=meta["off_b"],
    )

    vmem = pl.BlockSpec(memory_space=pltpu.MemorySpace.VMEM)
    return pl.pallas_call(
        kernel,
        out_shape=jax.ShapeDtypeStruct((B, dh), jnp.float32),
        in_specs=[vmem, vmem],
        out_specs=vmem,
    )(x, slab)


# ---------------------------------------------------------------------------
# Parameter init / packing
# ---------------------------------------------------------------------------
def init_params(key, n_obs, n_act, n_hidden):
    """PyTorch-style Linear init; weights stored as (in, out), biases as (1, out)."""
    ks = jax.random.split(key, 8)

    def lin(kw, kb, fan_in, fan_out):
        bound = 1.0 / jnp.sqrt(fan_in)
        w = jax.random.uniform(kw, (fan_in, fan_out), jnp.float32, -bound, bound)
        b = jax.random.uniform(kb, (1, fan_out), jnp.float32, -bound, bound)
        return w, b

    w1, b1 = lin(ks[0], ks[1], n_obs, n_hidden * 2)
    w2, b2 = lin(ks[2], ks[3], n_hidden * 2, n_hidden)
    wmu, bmu = lin(ks[4], ks[5], n_hidden, n_act)
    wls, bls = lin(ks[6], ks[7], n_hidden, n_act)
    return dict(w1=w1, b1=b1, w2=w2, b2=b2, wmu=wmu, bmu=bmu, wls=wls, bls=bls)


def pack_params(p):
    """Pack all weights/biases into ONE lane-dense (rows, 128) f32 slab.

    Layout (all sections start at sublane offsets that are multiples of 8 and
    at lane offset 0):
      rows [0,           rw1)          : w1    (n_obs, d1)
      rows [rw1,         rw1+rw2)      : w2    (d1,    d2)
      rows [rw1+rw2,     rw1+rw2+rwh)  : whead (d2,    dh) = [wmu | wls]
      rows [off_b+0 ..]                : b1 row, b2 row (+8), bhead row (+16)
    """
    w1, w2 = p["w1"], p["w2"]
    whead = jnp.concatenate([p["wmu"], p["wls"]], axis=1)
    bhead = jnp.concatenate([p["bmu"], p["bls"]], axis=1)

    n_obs, d1 = w1.shape
    _, d2 = w2.shape
    _, dh = whead.shape
    lw = _round_up(max(d1, d2, dh), 128)

    def pad(a, rows):
        return jnp.pad(a, ((0, rows - a.shape[0]), (0, lw - a.shape[1])))

    rw1 = _round_up(n_obs, 8)
    rw2 = _round_up(d1, 8)
    rwh = _round_up(d2, 8)

    slab = jnp.concatenate(
        [pad(w1, rw1), pad(w2, rw2), pad(whead, rwh),
         pad(p["b1"], 8), pad(p["b2"], 8), pad(bhead, 8)],
        axis=0,
    )
    meta = dict(n_obs=n_obs, d1=d1, d2=d2, dh=dh,
                off_w2=rw1, off_wh=rw1 + rw2, off_b=rw1 + rw2 + rwh)
    return slab, meta


def actor_reference(x, p):
    """Pure-JAX reference with the original (unfused) parameter layout."""
    silu = lambda v: v * jax.nn.sigmoid(v)
    h1 = silu(x @ p["w1"] + p["b1"])
    h2 = silu(h1 @ p["w2"] + p["b2"])
    mu = jax.nn.sigmoid(h2 @ p["wmu"] + p["bmu"])
    sigma = -jnp.clip(h2 @ p["wls"] + p["bls"], 0.0, 10.0)
    return mu, jnp.exp(sigma)


# ---------------------------------------------------------------------------
if __name__ == "__main__":
    n_obs, n_act, n_hidden, batch = 16, 8, 32, 8

    key = jax.random.PRNGKey(0)
    k_x, k_p = jax.random.split(key)
    x = jax.random.normal(k_x, (batch, n_obs), dtype=jnp.float32)
    params = init_params(k_p, n_obs, n_act, n_hidden)
    slab, meta = pack_params(params)

    packed_out = actor_forward(x, slab, meta)
    jax.block_until_ready(packed_out)

    # Split only here (caller side) for the reference check.
    mu, sig = packed_out[:, :n_act], packed_out[:, n_act:]
    mu_ref, sig_ref = actor_reference(x, params)

    assert packed_out.shape == (batch, 2 * n_act)
    assert jnp.allclose(mu, mu_ref, atol=1e-5, rtol=1e-5)
    assert jnp.allclose(sig, sig_ref, atol=1e-5, rtol=1e-5)

    print("KERNEL_OK")
</pallas_src>

<mosaic_0001>
module attributes {stable_mosaic.version = 11 : i64} {
  func.func @actor_kernel(%arg0: memref<8x16xf32, #tpu.memory_space<vmem>>, %arg1: memref<136x128xf32, #tpu.memory_space<vmem>>, %arg2: memref<8x16xf32, #tpu.memory_space<vmem>>) attributes {dimension_semantics = [], scalar_prefetch = 0 : i64, scratch_operands = 0 : i64, tpu.core_type = #tpu.core_type<tc>} {
    %c0 = arith.constant 0 : index
    %c0_0 = arith.constant 0 : index
    %0 = vector.load %arg0[%c0, %c0_0] : memref<8x16xf32, #tpu.memory_space<vmem>>, vector<8x16xf32>
    %c0_1 = arith.constant 0 : index
    %c0_2 = arith.constant 0 : index
    %1 = vector.load %arg1[%c0_1, %c0_2] : memref<136x128xf32, #tpu.memory_space<vmem>>, vector<16x64xf32>
    %c16 = arith.constant 16 : index
    %c0_3 = arith.constant 0 : index
    %2 = vector.load %arg1[%c16, %c0_3] : memref<136x128xf32, #tpu.memory_space<vmem>>, vector<64x32xf32>
    %c80 = arith.constant 80 : index
    %c0_4 = arith.constant 0 : index
    %3 = vector.load %arg1[%c80, %c0_4] : memref<136x128xf32, #tpu.memory_space<vmem>>, vector<32x16xf32>
    %c112 = arith.constant 112 : index
    %c0_5 = arith.constant 0 : index
    %4 = vector.load %arg1[%c112, %c0_5] : memref<136x128xf32, #tpu.memory_space<vmem>>, vector<1x64xf32>
    %c120 = arith.constant 120 : index
    %c0_6 = arith.constant 0 : index
    %5 = vector.load %arg1[%c120, %c0_6] : memref<136x128xf32, #tpu.memory_space<vmem>>, vector<1x32xf32>
    %c128 = arith.constant 128 : index
    %c0_7 = arith.constant 0 : index
    %6 = vector.load %arg1[%c128, %c0_7] : memref<136x128xf32, #tpu.memory_space<vmem>>, vector<1x16xf32>
    %cst = arith.constant dense<0.000000e+00> : vector<8x64xf32>
    %7 = tpu.matmul %0, %1, %cst {dimension_numbers = #tpu.dot_dimension_numbers<[1], [0], [0], [1], [0, 0, 1, 1], [], []>} : vector<8x16xf32>, vector<16x64xf32>, vector<8x64xf32> -> vector<8x64xf32>
    %8 = vector.broadcast %4 : vector<1x64xf32> to vector<8x64xf32>
    %9 = arith.addf %7, %8 : vector<8x64xf32>
    %10 = arith.negf %9 : vector<8x64xf32>
    %11 = math.exp %10 : vector<8x64xf32>
    %cst_8 = arith.constant 1.000000e+00 : f32
    %12 = vector.broadcast %cst_8 : f32 to vector<8x64xf32>
    %13 = arith.addf %12, %11 : vector<8x64xf32>
    %14 = arith.divf %12, %13 : vector<8x64xf32>
    %15 = arith.mulf %9, %14 : vector<8x64xf32>
    %cst_9 = arith.constant dense<0.000000e+00> : vector<8x32xf32>
    %16 = tpu.matmul %15, %2, %cst_9 {dimension_numbers = #tpu.dot_dimension_numbers<[1], [0], [0], [1], [0, 0, 1, 1], [], []>} : vector<8x64xf32>, vector<64x32xf32>, vector<8x32xf32> -> vector<8x32xf32>
    %17 = vector.broadcast %5 : vector<1x32xf32> to vector<8x32xf32>
    %18 = arith.addf %16, %17 : vector<8x32xf32>
    %19 = arith.negf %18 : vector<8x32xf32>
    %20 = math.exp %19 : vector<8x32xf32>
    %cst_10 = arith.constant 1.000000e+00 : f32
    %21 = vector.broadcast %cst_10 : f32 to vector<8x32xf32>
    %22 = arith.addf %21, %20 : vector<8x32xf32>
    %23 = arith.divf %21, %22 : vector<8x32xf32>
    %24 = arith.mulf %18, %23 : vector<8x32xf32>
    %cst_11 = arith.constant dense<0.000000e+00> : vector<8x16xf32>
    %25 = tpu.matmul %24, %3, %cst_11 {dimension_numbers = #tpu.dot_dimension_numbers<[1], [0], [0], [1], [0, 0, 1, 1], [], []>} : vector<8x32xf32>, vector<32x16xf32>, vector<8x16xf32> -> vector<8x16xf32>
    %26 = vector.broadcast %6 : vector<1x16xf32> to vector<8x16xf32>
    %27 = arith.addf %25, %26 : vector<8x16xf32>
    %28 = arith.negf %27 : vector<8x16xf32>
    %29 = math.exp %28 : vector<8x16xf32>
    %cst_12 = arith.constant 1.000000e+00 : f32
    %30 = vector.broadcast %cst_12 : f32 to vector<8x16xf32>
    %31 = arith.addf %30, %29 : vector<8x16xf32>
    %32 = arith.divf %30, %31 : vector<8x16xf32>
    %cst_13 = arith.constant 0.000000e+00 : f32
    %cst_14 = arith.constant 1.000000e+01 : f32
    %33 = vector.broadcast %cst_13 : f32 to vector<8x16xf32>
    %34 = arith.maximumf %33, %27 : vector<8x16xf32>
    %35 = vector.broadcast %cst_14 : f32 to vector<8x16xf32>
    %36 = arith.minimumf %35, %34 : vector<8x16xf32>
    %cst_15 = arith.constant 0.000000e+00 : f32
    %37 = vector.broadcast %cst_15 : f32 to vector<8x16xf32>
    %38 = arith.subf %37, %36 : vector<8x16xf32>
    %39 = math.exp %38 : vector<8x16xf32>
    %40 = tpu.iota {dimensions = array<i32: 1>} : vector<8x16xi32>
    %c8_i32 = arith.constant 8 : i32
    %41 = vector.broadcast %c8_i32 : i32 to vector<8x16xi32>
    %42 = arith.cmpi slt, %40, %41 : vector<8x16xi32>
    %43 = arith.select %42, %32, %39 : vector<8x16xi1>, vector<8x16xf32>
    %c0_16 = arith.constant 0 : index
    %c0_17 = arith.constant 0 : index
    %44 = vector.load %arg2[%c0_16, %c0_17] : memref<8x16xf32, #tpu.memory_space<vmem>>, vector<8x16xf32>
    tpu.vector_store %arg2[%c0_16, %c0_17], %43 {strides = array<i32>} : memref<8x16xf32, #tpu.memory_space<vmem>>, vector<8x16xf32>,
    return
  }
}

</mosaic_0001>

<bundles_post_ra>
// kernel: tpu_custom_call.1
= control target key start
LH: loop header
LB: loop body
LE: loop exit
PB: predicated region body
PF: predicated region fallthrough
CT: control target
= control target key end

     0   :  { %7 = vsyncpa [#allocation3], 0  ;;  %s582_s0 = inlined_call_operand.hbm [shape: f32[8,16], index: 0, kind: input, shape index: {}]   ;;  %s583_s1 = inlined_call_operand.hbm [shape: f32[136,128], index: 1, kind: input, shape index: {}]   ;;  %s584_s2 = inlined_call_operand.hbm [shape: f32[8,16], index: 2, kind: output, shape index: {}]  }
   0x1   :  { %8 = vsyncpa [#allocation6], 0 }
   0x2   :  { %9 = vsyncpa [#allocation4], 0  ;;  %s514_s9 = smov [#allocation2]   ;;  %s515_s11 = smov [#allocation5]  }
   0x3   :  { %s16_s10 = sshll.u32 %s514_s9, 4  ;;  %s25_s12 = sshll.u32 %s515_s11, 4  ;;  %s17_s10 = int_to_ptr.vmem [resolvable:$true] %s16_s10  ;;  %s537_s12 = int_to_ptr.vmem [resolvable:$true] %s25_s12 }
   0x4   :  { %s442_s15 = scalar_lea.hbm %s582_s0, 128 }
   0x5   :  { %p443_p0 = scmp.ne.s32.totalorder %s582_s0, %s442_s15  ;;  %p446_p1 = scmp.lt.u32.totalorder %s442_s15, %s582_s0 }
   0x7   :  { %p448_p2 = pnand %p446_p1, %p443_p0 }
   0x9   :  { %451 = shalt.err (!%p448_p2)
}
   0xa   :  { %s452_s20 = scalar_lea.vmem %s17_s10, 128  ;;  %p457_p4 = scmp.lt.s32.totalorder %s17_s10, %s17_s10 }
   0xb   :  { %p453_p3 = scmp.ne.s32.totalorder %s17_s10, %s452_s20  ;;  %p458_p5 = scmp.lt.s32.totalorder %s452_s20, %s452_s20 }
   0xd   :  { %p459_p6 = por %p458_p5, %p457_p4 }
   0xf   :  { %p460_p7 = pnand %p459_p6, %p453_p3 }
  0x11   :  { %463 = shalt.err (!%p460_p7)
}
  0x12   :  { %19 = dma.hbm_to_vmem [thread:$0]  %s582_s0, 128, %s17_s10, [#allocation3]  }
  0x13   :  { %s464_s25 = scalar_lea.hbm %s583_s1, 2176 }
  0x14   :  { %p465_p8 = scmp.ne.s32.totalorder %s583_s1, %s464_s25  ;;  %p468_p9 = scmp.lt.u32.totalorder %s464_s25, %s583_s1 }
  0x16   :  { %p470_p10 = pnand %p468_p9, %p465_p8 }
  0x18   :  { %473 = shalt.err (!%p470_p10)
}
  0x19   :  { %s474_s30 = scalar_lea.vmem %s537_s12, 2176  ;;  %p479_p12 = scmp.lt.s32.totalorder %s537_s12, %s537_s12 }
  0x1a   :  { %p475_p11 = scmp.ne.s32.totalorder %s537_s12, %s474_s30  ;;  %p480_p13 = scmp.lt.s32.totalorder %s474_s30, %s474_s30 }
  0x1c   :  { %p481_p0 = por %p480_p13, %p479_p12 }
  0x1e   :  { %p482_p1 = pnand %p481_p0, %p475_p11 }
  0x20   :  { %485 = shalt.err (!%p482_p1)
}
  0x21   :  { %s516_s0 = smov 128   ;;  %s517_s3 = smov 8  }
  0x22   :  { %31 = dma.hbm_to_vmem [thread:$0]  %s583_s1, 2176, %s537_s12, [#allocation6], %s516_s0, %s516_s0, %s517_s3  }
  0x23   :  { %508 = dma.done.wait [#allocation3], 128  }
  0x24   :  { %509 = vsyncadd [#allocation3], 4294967168 }
  0x25   :  { %510 = dma.done.wait [#allocation6], 2176  }
  0x26   :  { %511 = vsyncadd [#allocation6], 4294965120  ;;  %v518_v0 = vmov 0.0|0.0   ;;  %vm519_vm0 = vmmov 0   ;;  %v520_v1 = vmov 0.0   ;;  %v39_v2 = vld [vmem:[#allocation5] sm:$0xff]  ;;  %v315_v53 = vlaneseq }
  0x27   :  { %399 = vmatprep.subr.bf16.mxu0 %v518_v0  ;;  %366 = vmatprep.mubr.msk.f32.mxu0 %vm519_vm0, %v520_v1  ;;  %v40_v3 = vld [vmem:[#allocation5 + $0x8] sm:$0xff]  ;;  %v38_v5 = vld [vmem:[#allocation2] sm:$0xff]  ;;  %vm60_vm1 = vcmask 130048   ;;  %v41_v6 = vld [vmem:[#allocation5 + $0x10] sm:$0xff]  ;;  %vm145_vm2 = vcmask 523264   ;;  %vm230_vm3 = vcmask 261120  }
  0x28   :  { %402 = vmatprep.subr.bf16.mxu1 %v518_v0  ;;  %385 = vmatprep.mubr.msk.f32.mxu1 %vm519_vm0, %v520_v1  ;;  %v400_v4 = vpack.c.bf16 %v40_v3, %v39_v2  ;;  %v42_v7 = vld [vmem:[#allocation5 + $0x18] sm:$0xff]  ;;  %v43_v9 = vld [vmem:[#allocation5 + $0x20] sm:$0xff]  ;;  %v44_v10 = vld [vmem:[#allocation5 + $0x28] sm:$0xff]  ;;  %v316_v54 = vand.u32 127, %v315_v53  ;;  %s521_s1 = smov [#allocation7]  }
  0x29   :  { %v403_v8 = vpack.c.bf16 %v42_v7, %v41_v6  ;;  %v406_v11 = vpack.c.bf16 %v44_v10, %v43_v9  ;;  %v45_v12 = vld [vmem:[#allocation5 + $0x30] sm:$0xff]  ;;  %v46_v13 = vld [vmem:[#allocation5 + $0x38] sm:$0xff]  ;;  %v47_v15 = vld [vmem:[#allocation5 + $0x40] sm:$0xff]  ;;  %s326_s6 = sshll.u32 %s521_s1, 4  ;;  %s327_s6 = int_to_ptr.vmem [resolvable:$true] %s326_s6 }
  0x2a   :  { %401 = vmatpush3.bf16.msra.mxu0 %v400_v4  ;;  %v409_v14 = vpack.c.bf16 %v46_v13, %v45_v12  ;;  %v48_v16 = vld [vmem:[#allocation5 + $0x48] sm:$0xff]  ;;  %v336_v18 = vld [vmem:[#allocation5 + $0x70] ss:$0 sm:$0xff]  ;;  %v50_v28 = vld [vmem:[#allocation5 + $0x58] sm:$0xff]  ;;  %vm317_vm4 = vcmp.lt.s32.totalorder %v316_v54, 8  ;;  %s486_s7 = scalar_lea.vmem %s327_s6, 128  ;;  %p491_p3 = scmp.lt.s32.totalorder %s327_s6, %s327_s6 }
  0x2b   :  { %414 = vmatprep.subr.bf16.mxu0 %v518_v0  ;;  %404 = vmatpush3.bf16.msra.mxu1 %v403_v8  ;;  %v412_v17 = vpack.c.bf16 %v48_v16, %v47_v15  ;;  %v49_v27 = vld [vmem:[#allocation5 + $0x50] sm:$0xff]  ;;  %v51_v30 = vld [vmem:[#allocation5 + $0x60] sm:$0xff]  ;;  %v52_v31 = vld [vmem:[#allocation5 + $0x68] sm:$0xff]  ;;  %p487_p2 = scmp.ne.s32.totalorder %s327_s6, %s486_s7  ;;  %p492_p4 = scmp.lt.s32.totalorder %s486_s7, %s486_s7 }
  0x2c   :  { %405 = vmatprep.subr.bf16.mxu1 %v518_v0  ;;  %v415_v29 = vpack.c.bf16 %v50_v28, %v49_v27  ;;  %v418_v32 = vpack.c.bf16 %v52_v31, %v51_v30  ;;  %v339_v33 = vld [vmem:[#allocation5 + $0x78] ss:$0 sm:$0xff]  ;;  %v342_v42 = vld [vmem:[#allocation5 + $0x80] ss:$0 sm:$0xff] }
  0x2d   :  { %367 = vmatmul.mubr.msk.f32.vlgmr.msra.gmra.mrb[0].mxu0 %vm60_vm1, %v38_v5  ;;  %p493_p5 = por %p492_p4, %p491_p3 }
  0x2e   :  { %396 = vmatprep.mubr.msk.f32.mxu0 %vm519_vm0, %v520_v1  ;;  %416 = vmatpush3.bf16.msra.mxu0 %v415_v29 }
  0x2f   :  { %407 = vmatpush3.bf16.msra.mxu1 %v406_v11  ;;  %417 = vmatprep.subr.bf16.mxu0 %v518_v0  ;;  %p494_p6 = pnand %p493_p5, %p487_p2 }
  0x30   :  { %408 = vmatprep.subr.bf16.mxu1 %v518_v0 }
  0x32   :  { %419 = vmatpush3.bf16.msra.mxu0 %v418_v32 }
  0x33   :  { %410 = vmatpush3.bf16.msra.mxu1 %v409_v14 }
  0x34   :  { %411 = vmatprep.subr.bf16.mxu1 %v518_v0 }
  0x37   :  { %413 = vmatpush3.bf16.msra.mxu1 %v412_v17 }
 0x100   :  { %v130_v19 = vpop.f32.mrb[0].mxu0 }
 0x101   :  { %v131_v20 = vadd.f32 %v336_v18, %v130_v19  ;;  %v368_v21 = vpop.f32.mrb[1].mxu0 }
 0x103   :  { %v338_v22 = vmul.f32 -1.442695, %v131_v20 }
 0x105   :  { %428 = vpow2.f32 %v338_v22 }
 0x10f   :  { %v429_v23 = vpop.eup %428 }
 0x110   :  { %v137_v24 = vadd.f32 1.0, %v429_v23 }
 0x112   :  { %430 = vrcp.f32 %v137_v24 }
 0x11c   :  { %v431_v25 = vpop.eup %430 }
 0x11d   :  { %v140_v26 = vmul.f32 %v431_v25, %v131_v20 }
 0x11f   :  { %386 = vmatmul.mubr.msk.f32.vlgmr.msra.gmra.mrb[0].mxu1 %vm145_vm2, %v140_v26 }
 0x1f2   :  { %v215_v34 = vpop.f32.mrb[0].mxu1 }
 0x1f3   :  { %v216_v35 = vadd.f32 %v339_v33, %v215_v34  ;;  %v387_v36 = vpop.f32.mrb[1].mxu1 }
 0x1f5   :  { %v341_v37 = vmul.f32 -1.442695, %v216_v35 }
 0x1f7   :  { %432 = vpow2.f32 %v341_v37 }
 0x201   :  { %v433_v38 = vpop.eup %432 }
 0x202   :  { %v222_v39 = vadd.f32 1.0, %v433_v38 }
 0x204   :  { %434 = vrcp.f32 %v222_v39 }
 0x20e   :  { %v435_v40 = vpop.eup %434 }
 0x20f   :  { %v225_v41 = vmul.f32 %v435_v40, %v216_v35 }
 0x211   :  { %397 = vmatmul.mubr.msk.f32.vlgmr.msra.gmra.mrb[2].mxu0 %vm230_vm3, %v225_v41 }
 0x2e4   :  { %v300_v43 = vpop.f32.mrb[2].mxu0 }
 0x2e5   :  { %v301_v44 = vadd.f32 %v342_v42, %v300_v43  ;;  %v398_v45 = vpop.f32.mrb[3].mxu0 }
 0x2e7   :  { %v344_v46 = vmul.f32 -1.442695, %v301_v44  ;;  %v310_v47 = vmax.f32 %v301_v44, 0.0 }
 0x2e9   :  { %436 = vpow2.f32 %v344_v46  ;;  %v311_v48 = vmin.f32 %v310_v47, 10.0 }
 0x2eb   :  { %v312_v49 = vsub.f32 0.0, %v311_v48 }
 0x2ed   :  { %v313_v50 = vmul.f32 1.442695, %v312_v49 }
 0x2ef   :  { %438 = vpow2.f32 %v313_v50 }
 0x2f3   :  { %v437_v51 = vpop.eup %436 }
 0x2f4   :  { %v307_v52 = vadd.f32 1.0, %v437_v51 }
 0x2f6   :  { %440 = vrcp.f32 %v307_v52 }
 0x2f9   :  { %v439_v55 = vpop.eup %438 }
 0x300   :  { %v441_v56 = vpop.eup %440 }
 0x301   :  { %v318_v57 = vsel %vm317_vm4, %v441_v56, %v439_v55 }
 0x302   :  { %319 = vst.msk [vmem:[#allocation7] sm:$0xff] %vm60_vm1, %v318_v57 }
 0x303   :  { %497 = shalt.err (!%p494_p6)
}
 0x304   :  { %s498_s10 = scalar_lea.hbm %s584_s2, 128 }
 0x305   :  { %p499_p7 = scmp.ne.s32.totalorder %s584_s2, %s498_s10  ;;  %p502_p8 = scmp.lt.u32.totalorder %s498_s10, %s584_s2 }
 0x307   :  { %p504_p9 = pnand %p502_p8, %p499_p7 }
 0x309   :  { %507 = shalt.err (!%p504_p9)
}
 0x30a   :  { %329 = dma.vmem_to_hbm [thread:$0]  %s327_s6, 128, %s584_s2, [#allocation4]  }
 0x30b   :  { %512 = dma.done.wait [#allocation4], 128  }
 0x30c   :  { %513 = vsyncadd [#allocation4], 4294967168 }
 0x30d   :  { %333 = vsyncpa [#allocation3], 1 }
 0x30e   :  { %334 = vsyncpa [#allocation6], 1 }
 0x30f   :  { %335 = vsyncpa [#allocation4], 1 }

</bundles_post_ra>
